<compile_context>
chip_gen: v5e
topology: v5e:2x2
jax: 0.10.0
libtpu: 0.0.40
codegen_flags: <defaults>
</compile_context>

<pallas_src>
import math

import jax
import jax.numpy as jnp
from jax.experimental import pallas as pl
from jax.experimental.pallas import tpu as pltpu


def _cdiv(a, b):
    return -(-a // b)


def _round_up(v, m):
    return ((v + m - 1) // m) * m


def _ghost_conv_kernel(x_ref, w_ref, out_ref):
    # x_ref:   (Bt, Cin, T)       spatial on lanes, channels on sublanes
    # w_ref:   (out_chan, Cin)    folded weight (primary + scaled-primary rows)
    # out_ref: (Bt, out_chan, T)
    w = w_ref[...]
    for b in range(x_ref.shape[0]):  # Bt is small and static (<= 16)
        out_ref[b] = jnp.dot(
            w, x_ref[b], preferred_element_type=jnp.float32
        ).astype(out_ref.dtype)


def ghost_conv(x_nchw, w_primary, w_cheap, out_chan, ratio=2, *, tile_s=65536):
    """GhostConv forward (ks=1, dw_size=1, stride=1).

    x_nchw:    (N, Cin, H, W)
    w_primary: (init_channels, Cin)   -- primary_conv.weight squeezed
    w_cheap:   (new_channels,)        -- cheap_operation.weight squeezed
    """
    n, cin, h, w = x_nchw.shape
    new_channels = w_cheap.shape[0]
    hw = h * w
    dtype = x_nchw.dtype

    # ---- Fold cheap op (depthwise 1x1 == per-channel scale) + concat + slice
    # into one (out_chan, Cin) weight, computed once outside the grid.
    # Cheap output channel j reads x1 channel j // (ratio - 1).
    group_idx = jnp.arange(new_channels) // max(ratio - 1, 1)
    w_ghost = w_cheap[:, None] * w_primary[group_idx]                  # (new_channels, Cin)
    w_full = jnp.concatenate([w_primary, w_ghost], axis=0)[:out_chan]  # (out_chan, Cin)
    w_full = w_full.astype(jnp.float32)  # tiny; keep f32, dot is mixed-precision

    # ---- Layout: channels on sublanes, spatial on lanes. No transposes, no pad.
    x3 = x_nchw.reshape(n, cin, hw)

    # Sanitize user tile size to a lane multiple (avoid masked vst.msk stores).
    tile_s = max(128, (int(tile_s) // 128) * 128)
    hw_128 = _round_up(hw, 128)

    if n > 1 and 2 * hw_128 <= tile_s:
        # --- small-map regime: fuse several batch elements per grid step ---
        bt = max(1, min(n, 16, tile_s // hw_128))
        if bt >= n and n >= 2:
            # keep >=2 grid steps along the 'parallel' axis (v7x has 2 TCs)
            bt = _cdiv(n, 2)
        grid = (_cdiv(n, bt),)
        in_specs = [
            pl.BlockSpec((bt, cin, hw), lambda b: (b, 0, 0)),
            pl.BlockSpec((out_chan, cin), lambda b: (0, 0)),
        ]
        out_spec = pl.BlockSpec((bt, out_chan, hw), lambda b: (b, 0, 0))
        dims = ("parallel",)
    else:
        # --- large-map regime: per-batch spatial tiles (multiple of 128) ---
        tile = min(tile_s, hw_128)
        if n == 1 and tile >= hw and hw > 128:
            # single batch, single tile would leave one TensorCore idle on v7x
            tile = max(128, _round_up(_cdiv(hw, 2), 128))
        grid = (n, _cdiv(hw, tile))
        in_specs = [
            pl.BlockSpec((1, cin, tile), lambda b, s: (b, 0, s)),
            pl.BlockSpec((out_chan, cin), lambda b, s: (0, 0)),
        ]
        out_spec = pl.BlockSpec((1, out_chan, tile), lambda b, s: (b, 0, s))
        dims = ("parallel", "parallel")

    out3 = pl.pallas_call(
        _ghost_conv_kernel,
        out_shape=jax.ShapeDtypeStruct((n, out_chan, hw), dtype),
        grid_spec=pl.GridSpec(grid=grid, in_specs=in_specs, out_specs=out_spec),
        compiler_params=pltpu.CompilerParams(dimension_semantics=dims),
    )(x3, w_full)

    return out3.reshape(n, out_chan, h, w)


def ghost_conv_ref(x_nchw, w_primary, w_cheap, out_chan, ratio=2):
    """Pure-JAX reference (matches the PyTorch forward for ks=dw_size=1)."""
    x1 = jnp.einsum("nchw,oc->nohw", x_nchw, w_primary)
    group_idx = jnp.arange(w_cheap.shape[0]) // max(ratio - 1, 1)
    x2 = x1[:, group_idx] * w_cheap[None, :, None, None]
    out = jnp.concatenate([x1, x2], axis=1)
    return out[:, :out_chan, :, :]


if __name__ == "__main__":
    # Module config (defaults): ks=1, dw_size=1, ratio=2, stride=1
    in_chan, out_chan, ratio = 4, 8, 2
    init_channels = math.ceil(out_chan / ratio)      # 4
    new_channels = init_channels * (ratio - 1)       # 4

    key = jax.random.PRNGKey(0)
    kx, kw1, kw2, kx2 = jax.random.split(key, 4)

    # primary_conv.weight: (init_channels, in_chan, 1, 1) -> (init_channels, in_chan)
    w_primary = jax.random.normal(kw1, (init_channels, in_chan), dtype=jnp.float32) * 0.1
    # cheap_operation.weight: (new_channels, 1, 1, 1) -> (new_channels,)
    w_cheap = jax.random.normal(kw2, (new_channels,), dtype=jnp.float32) * 0.1

    # --- Test 1: batch-fused small-map regime (N=2, 16x16) ---
    N, H, W = 2, 16, 16
    x = jax.random.normal(kx, (N, in_chan, H, W), dtype=jnp.float32)
    out = jax.block_until_ready(ghost_conv(x, w_primary, w_cheap, out_chan, ratio))
    ref = ghost_conv_ref(x, w_primary, w_cheap, out_chan, ratio)
    assert out.shape == (N, out_chan, H, W), out.shape
    assert jnp.allclose(out, ref, atol=1e-5, rtol=1e-5), float(jnp.max(jnp.abs(out - ref)))

    # --- Test 2: spatial-tile regime with ragged last block (N=1, 24x24, hw=576) ---
    N2, H2, W2 = 1, 24, 24
    x2 = jax.random.normal(kx2, (N2, in_chan, H2, W2), dtype=jnp.float32)
    out2 = jax.block_until_ready(ghost_conv(x2, w_primary, w_cheap, out_chan, ratio))
    ref2 = ghost_conv_ref(x2, w_primary, w_cheap, out_chan, ratio)
    assert out2.shape == (N2, out_chan, H2, W2), out2.shape
    assert jnp.allclose(out2, ref2, atol=1e-5, rtol=1e-5), float(jnp.max(jnp.abs(out2 - ref2)))

    print("KERNEL_OK")
</pallas_src>

<mosaic_0001>
module attributes {stable_mosaic.version = 11 : i64} {
  func.func @_ghost_conv_kernel(%arg0: i32, %arg1: memref<1x4x256xf32, #tpu.memory_space<vmem>>, %arg2: memref<8x4xf32, #tpu.memory_space<vmem>>, %arg3: memref<1x8x256xf32, #tpu.memory_space<vmem>>) attributes {dimension_semantics = [#tpu.dimension_semantics<parallel>], iteration_bounds = array<i64: 2>, scalar_prefetch = 0 : i64, scratch_operands = 0 : i64, tpu.core_type = #tpu.core_type<tc>, window_params = [{transform_indices = @transform_0, window_bounds = array<i64: 1, 4, 256>}, {pipeline_mode = #tpu.pipeline_mode<synchronous>, transform_indices = @transform_1, window_bounds = array<i64: 8, 4>}, {transform_indices = @transform_2, window_bounds = array<i64: 1, 8, 256>}]} {
    %c0 = arith.constant 0 : index
    %c0_0 = arith.constant 0 : index
    %0 = vector.load %arg2[%c0, %c0_0] : memref<8x4xf32, #tpu.memory_space<vmem>>, vector<8x4xf32>
    %c0_1 = arith.constant 0 : index
    %c0_2 = arith.constant 0 : index
    %c0_3 = arith.constant 0 : index
    %1 = vector.load %arg1[%c0_1, %c0_2, %c0_3] : memref<1x4x256xf32, #tpu.memory_space<vmem>>, vector<1x4x256xf32>
    %2 = vector.shape_cast %1 : vector<1x4x256xf32> to vector<4x256xf32>
    %cst = arith.constant dense<0.000000e+00> : vector<8x256xf32>
    %3 = tpu.matmul %0, %2, %cst {dimension_numbers = #tpu.dot_dimension_numbers<[1], [0], [0], [1], [0, 0, 1, 1], [], []>} : vector<8x4xf32>, vector<4x256xf32>, vector<8x256xf32> -> vector<8x256xf32>
    %c0_4 = arith.constant 0 : index
    %c0_5 = arith.constant 0 : index
    %c0_6 = arith.constant 0 : index
    %4 = vector.load %arg3[%c0_4, %c0_5, %c0_6] : memref<1x8x256xf32, #tpu.memory_space<vmem>>, vector<1x8x256xf32>
    %5 = vector.shape_cast %4 : vector<1x8x256xf32> to vector<8x256xf32>
    %6 = vector.shape_cast %3 : vector<8x256xf32> to vector<1x8x256xf32>
    tpu.vector_store %arg3[%c0_4, %c0_5, %c0_6], %6 {strides = array<i32>} : memref<1x8x256xf32, #tpu.memory_space<vmem>>, vector<1x8x256xf32>,
    return
  }
  func.func @transform_0(%arg0: i32) -> (i32, i32, i32) {
    %c0_i32 = arith.constant 0 : i32
    %c0_i32_0 = arith.constant 0 : i32
    %c0_i32_1 = arith.constant 0 : i32
    return %arg0, %c0_i32, %c0_i32_0 : i32, i32, i32
  }
  func.func @transform_1(%arg0: i32) -> (i32, i32) {
    %c0_i32 = arith.constant 0 : i32
    %c0_i32_0 = arith.constant 0 : i32
    %c0_i32_1 = arith.constant 0 : i32
    return %c0_i32, %c0_i32_0 : i32, i32
  }
  func.func @transform_2(%arg0: i32) -> (i32, i32, i32) {
    %c0_i32 = arith.constant 0 : i32
    %c0_i32_0 = arith.constant 0 : i32
    %c0_i32_1 = arith.constant 0 : i32
    return %arg0, %c0_i32, %c0_i32_0 : i32, i32, i32
  }
}

</mosaic_0001>

<bundles_post_ra>
// kernel: tpu_custom_call.1
= control target key start
LH: loop header
LB: loop body
LE: loop exit
PB: predicated region body
PF: predicated region fallthrough
CT: control target
= control target key end

     0   :  { %7 = vsyncpa [#allocation3], 0  ;;  %s616_s0 = inlined_call_operand.hbm [shape: f32[2,4,256], index: 0, kind: input, shape index: {}]   ;;  %s617_s1 = inlined_call_operand.vmem [shape: f32[8,4], index: 1, kind: input, shape index: {}]   ;;  %s618_s2 = inlined_call_operand.hbm [shape: f32[2,8,256], index: 2, kind: output, shape index: {}]  }
   0x1   :  { %9 = vsyncpa [#allocation3 + $0x1], 0 }
   0x2   :  { %10 = vsyncpa [#allocation4], 0 }
   0x3   :  { %12 = vsyncpa [#allocation4 + $0x1], 0  ;;  %s485_s9 = smov 0   ;;  %s487_s10 = smov 0  }
   0x4   :  { %s489_s11 = smov 0   ;;  %s491_s12 = smov 0  }
   0x5 LB: > { %s506_s13 = sadd.s32 4294967295, %s468_s12   ;;  %s306_s14 = sadd.s32 4294967294, %s468_s12   ;;  %s468_s12 = sphi %s491_s12, %s628_s12   ;;  %s464_s11 = sphi %s489_s11, %s627_s11   ;;  %s460_s10 = sphi %s487_s10, %s626_s10   ;;  %s456_s9 = sphi %s485_s9, %s625_s9  }
   0x6   : > { %s510_s15 = sadd.s32 1, %s468_s12   ;;  %s25_s16 = sadd.s32 1, %s464_s11 }
   0x7   : > { %s22_s17 = ssub.s32 %s468_s12, %s510_s15  ;;  %p32_p0 = scmp.ne.s32.totalorder %s464_s11, %s460_s10 }
   0x8   : > { %p23_p1 = scmp.eq.s32.totalorder %s22_s17, 0  ;;  %p33_p2 = scmp.eq.s32.totalorder %s468_s12, 0 }
   0x9   : > { %p38_p3 = scmp.ne.s32.totalorder %s460_s10, %s456_s9  ;;  %p39_p4 = scmp.eq.s32.totalorder %s506_s13, 0 }
   0xa   : > { %s522_s18 = scalar_select %p23_p1, %s464_s11, %s25_s16  }
   0xb   : > { %p524_p5 = por %p33_p2, %p32_p0  ;;  %p528_p6 = por %p39_p4, %p38_p3 }
   0xc   : > { %p83_p7 = scmp.eq.s32.totalorder %s506_s13, 1  ;;  %p89_p8 = scmp.eq.s32.totalorder %s306_s14, 1 }
   0xd   : > { %p338_p10 = scmp.lt.s32.totalorder %s468_s12, 2  ;;  %s112_s23 = sand.u32 1, %s464_s11  }
   0xe   : > { %p535_p11 = por %p83_p7, %p32_p0  ;;  %p539_p12 = por %p89_p8, %p38_p3 }
   0xf   : > { %s324_s24 = sshll.u32 %s468_s12, 3  ;;  %s309_s25 = sshll.u32 %s112_s23, 3 }
  0x10   : > { %s121_s28 = scalar_lea.hbm %s616_s0, %s324_s24  ;;  %s116_s30 = scalar_lea.vmem [#allocation2], %s309_s25 }
  0x11   : > { %s123_s29 = sshll.u32 %s121_s28, 4  ;;  %s125_s3 = sshll.u32 %s116_s30, 4  ;;  %s124_s29 = int_to_ptr.hbm [resolvable:$true] %s123_s29  ;;  %s126_s3 = int_to_ptr.vmem [resolvable:$true] %s125_s3 }
  0x12   : > { %p550_p13 = pnand %p338_p10, %p524_p5  ;;  %p312_p0 = scmp.ge.s32.totalorder %s468_s12, 1 }
  0x13   : > { %p130_p1 = scmp.lt.s32.totalorder %s468_s12, 3  ;;  %s113_s5 = scalar_lea.sflag [#allocation3], %s112_s23 }
  0x14   : > { %s372_s6 = sshra.s32 %s124_s29, 4  ;;  %p376_p3 = pneg %p550_p13  ;;  %s373_s6 = int_to_ptr.hbm [resolvable:$true] %s372_s6 }
  0x15   : > { %s374_s7 = scalar_lea.hbm %s373_s6, 8  ;;  %s379_s16 = scalar_lea.hbm %s616_s0, 16 }
  0x16   : > { %p375_p2 = scmp.ne.s32.totalorder %s373_s6, %s374_s7  ;;  %p380_p5 = scmp.lt.s32.totalorder %s373_s6, %s616_s0 }
  0x17   : > { %p381_p8 = scmp.lt.s32.totalorder %s379_s16, %s374_s7 }
  0x18   : > { %p377_p4 = pnand %p376_p3, %p375_p2 }
  0x19   : > { %p382_p10 = por %p381_p8, %p380_p5 }
  0x1a   : > { %p378_p7 = pneg %p377_p4 }
  0x1c   : > { %p383_p9 = pnand %p382_p10, %p378_p7 }
  0x1e   : > { %386 = shalt.err (!%p383_p9)
}
  0x1f   : > { %333 = dma.hbm_to_vmem [thread:$0]  (!%p550_p13), %s124_s29, 128, %s126_s3, %s113_s5  }
  0x20   : > { %p131_p2 = pnand %p312_p0, %p130_p1 }
  0x21   : > { %s571_s23 = sand.u32 (!%p131_p2), 1, %s460_s10  }
  0x22   : > { %134 = sbr.rel (%p131_p2) target bundleno = 180 (0xb4), region = 28  ;;  %s313_s24 = sshll.u32 (!%p131_p2), %s571_s23, 3 }
  0x23   : > { %s137_s25 = scalar_lea.sflag (!%p131_p2), [#allocation3], %s571_s23  ;;  %s140_s26 = scalar_lea.vmem (!%p131_p2), [#allocation2], %s313_s24 }
  0x27   : > { %447 = dma.done.wait (%p528_p6), %s137_s25, 128  }
  0x28   : > { %449 = vsyncadd (%p528_p6), %s137_s25, 4294967168  ;;  %v163_v0 = vld [vmem:[%s140_s26] sm:$0xff]  ;;  %vm172_vm0 = vcmask 1043456   ;;  %v162_v1 = vld [vmem:[%s617_s1] sm:$0xff]  ;;  %vm168_vm1 = vcmask 31744   ;;  %s314_s29 = sshll.u32 %s571_s23, 4 }
  0x29   : > { %165 = vst [vmem:[#allocation1] ss:$2 sm:$0xff] %v163_v0  ;;  %s325_s20 = sshll.u32 %s506_s13, 4  ;;  %s161_s5 = scalar_lea.vmem [#allocation5], %s314_s29 }
  0x2a   : > { %s231_s4 = scalar_lea.hbm %s618_s2, %s325_s20  ;;  %s233_s6 = sshll.u32 %s161_s5, 4  ;;  %s234_s6 = int_to_ptr.vmem [resolvable:$true] %s233_s6 }
  0x2b   : > { %s235_s7 = sshll.u32 %s231_s4, 4  ;;  %s220_s8 = scalar_lea.sflag [#allocation4], %s571_s23  ;;  %s236_s7 = int_to_ptr.hbm [resolvable:$true] %s235_s7 }
  0x2c   : > { %s416_s14 = sshra.s32 %s236_s7, 4  ;;  %s422_s19 = scalar_lea.hbm %s618_s2, 32  ;;  %s417_s14 = int_to_ptr.hbm [resolvable:$true] %s416_s14 }
  0x2d   : > { %s418_s16 = scalar_lea.hbm %s417_s14, 16  ;;  %p423_p0 = scmp.lt.s32.totalorder %s417_s14, %s618_s2 }
  0x2e   : > { %p419_p6 = scmp.ne.s32.totalorder %s417_s14, %s418_s16  ;;  %p424_p1 = scmp.lt.s32.totalorder %s422_s19, %s418_s16 }
  0x30   : > { %v166_v2 = vld.sshfl [vmem:[#allocation1] sm:$0xff pattern:$0x75316420]  ;;  %v167_v3 = vld.sshfl [vmem:[#allocation1 + $0x8] sm:$0xff pattern:$0x75316420]  ;;  %p420_p9 = pnand %p419_p6, %p535_p11  ;;  %p425_p3 = por %p424_p1, %p423_p0 }
  0x31   : > { %315 = vmatpush.msk.msra.mxu0 %vm172_vm0, %v166_v2  ;;  %317 = vmatpush.msk.msra.mxu1 %vm172_vm0, %v167_v3 }
  0x32   : > { %316 = vmatmul.msk.f32.vlgmr.msra.gmra.mxu0 %vm168_vm1, %v162_v1  ;;  %318 = vmatmul.msk.f32.vlgmr.msra.gmra.mxu1 %vm168_vm1, %v162_v1  ;;  %p421_p13 = pneg %p420_p9 }
  0x34   : > { %p426_p4 = pnand %p425_p3, %p421_p13 }
  0xaf   : > { %v194_v4 = vpop.f32.mrf.mxu0  ;;  %v214_v5 = vpop.f32.mrf.mxu1 }
  0xb0   : > { %217 = vst [vmem:[%s161_s5] sm:$0xff] %v194_v4 }
  0xb1   : > { %218 = vst [vmem:[%s161_s5 + $0x8] sm:$0xff] %v214_v5 }
  0xb2   : > { %429 = shalt.err (!%p426_p4)
}
  0xb3   : > { %328 = dma.vmem_to_hbm [thread:$0]  (%p535_p11), %s234_s6, 256, %s236_s7, %s220_s8  }
  0xb4 PF: > { %s247_s23 = sand.u32 1, %s456_s9   ;;  %p624_p7 = scmp.ge.s32.totalorder %s468_s12, 2 }
  0xb5   : > { %s248_s26 = scalar_lea.sflag [#allocation4], %s247_s23 }
  0xb6   : > { %p335_p5 = pnand %p624_p7, %p539_p12 }
  0xb8   : > { %p336_p8 = pneg %p335_p5 }
  0xba   : > { %451 = dma.done.wait (%p336_p8), %s248_s26, 256  }
  0xbb   : > { %453 = vsyncadd (%p336_p8), %s248_s26, 4294967040  ;;  %p15_p10 = scmp.ge.s32.totalorder %s510_s15, 4   ;;  %s625_s9 = smov %s460_s10 }
  0xbc   : > { %s626_s10 = smov %s464_s11  ;;  %s627_s11 = smov %s522_s18 }
  0xbd   : > { %s628_s12 = smov %s510_s15  ;;  %17 = sbr.rel (!%p15_p10) target bundleno = 5 (0x5), region = 73 }
  0xc2   :  { %254 = vsyncpa [#allocation3], 1 }
  0xc3   :  { %256 = vsyncpa [#allocation3 + $0x1], 1 }
  0xc4   :  { %257 = vsyncpa [#allocation4], 1 }
  0xc5   :  { %259 = vsyncpa [#allocation4 + $0x1], 1 }

</bundles_post_ra>
